<compile_context>
chip_gen: v7x
topology: tpu7x:2x2x1
jax: 0.10.0
libtpu: 0.0.40
codegen_flags: <defaults>
</compile_context>

<pallas_src>
import functools

import jax
import jax.numpy as jnp
from jax.experimental import pallas as pl
from jax.experimental.pallas import tpu as pltpu


def _cdiv(a: int, b: int) -> int:
    return (a + b - 1) // b


def _round_up(x: int, m: int) -> int:
    return ((x + m - 1) // m) * m


def mlp_kernel(x_ref, w1_ref, b1_ref, w2_ref, b2_ref, w3_ref, b3_ref, o_ref):
    # Cast activations to bf16 inside the kernel (weights are pre-cast bf16); accumulate in f32.
    x = x_ref[...].astype(w1_ref.dtype)

    # Layer 1: Linear(K, 512) + bias + ReLU
    h1 = jnp.dot(x, w1_ref[...], preferred_element_type=jnp.float32)
    h1 = jnp.maximum(h1 + b1_ref[...], 0.0)
    # (Dropout p=0.2 -> identity in eval mode)

    # Layer 2: Linear(512, 128) + bias + ReLU
    h2 = jnp.dot(h1.astype(w2_ref.dtype), w2_ref[...],
                 preferred_element_type=jnp.float32)
    h2 = jnp.maximum(h2 + b2_ref[...], 0.0)
    # (Dropout p=0.2 -> identity in eval mode)

    # Layer 3: Linear(128, num_classes) + bias  (unpadded output)
    logits = jnp.dot(h2.astype(w3_ref.dtype), w3_ref[...],
                     preferred_element_type=jnp.float32)
    o_ref[...] = (logits + b3_ref[...]).astype(o_ref.dtype)


def prepare_params(params):
    """One-time packing of canonical f32 params ([in,out] weights, [1,out] biases) for the kernel."""
    w1, b1, w2, b2, w3, b3 = params
    cd = jnp.bfloat16
    return (
        w1.astype(cd), b1.reshape(1, -1).astype(jnp.float32),
        w2.astype(cd), b2.reshape(1, -1).astype(jnp.float32),
        w3.astype(cd), b3.reshape(1, -1).astype(jnp.float32),
    )


@functools.partial(jax.jit, static_argnames=("tb",))
def clause_classifier_forward(x, packed_params, *, tb: int = 1024):
    """Fused MLP forward. x: [B, input_size] f32 -> logits [B, num_classes] f32."""
    w1, b1, w2, b2, w3, b3 = packed_params
    B, K = x.shape
    H1 = w1.shape[1]
    H2 = w2.shape[1]
    N = w3.shape[1]

    # --- batch tiling ---------------------------------------------------------------------
    # Single step -> full-extent block (always legal, even if B < 8). Multi-step -> TB is a
    # multiple of 16 (bf16 sublane packing); a partial last block is handled by Pallas
    # (padded reads, masked writes). When B is large enough, force >=2 steps so the
    # "parallel" batch axis can shard across v7x's two TensorCores.
    MIN_ROWS = 16
    n_steps = max(1, _cdiv(B, tb))
    if n_steps == 1 and B >= 2 * MIN_ROWS:
        n_steps = 2
    if n_steps == 1:
        TB = B
    else:
        TB = _round_up(_cdiv(B, n_steps), MIN_ROWS)
    grid = (_cdiv(B, TB),)

    # x / out tiles move per grid step; weights & biases use a constant index_map so they
    # stay resident in VMEM across all batch tiles.
    in_specs = [
        pl.BlockSpec((TB, K), lambda i: (i, 0)),    # x tile (unpadded f32)
        pl.BlockSpec((K, H1), lambda i: (0, 0)),    # w1 (bf16)
        pl.BlockSpec((1, H1), lambda i: (0, 0)),    # b1 (f32)
        pl.BlockSpec((H1, H2), lambda i: (0, 0)),   # w2 (bf16)
        pl.BlockSpec((1, H2), lambda i: (0, 0)),    # b2 (f32)
        pl.BlockSpec((H2, N), lambda i: (0, 0)),    # w3 (bf16)
        pl.BlockSpec((1, N), lambda i: (0, 0)),     # b3 (f32)
    ]
    out_specs = pl.BlockSpec((TB, N), lambda i: (i, 0))

    # --- VMEM budget (computed need with ~2x headroom; fits v7x's 64 MiB physical VMEM) ----
    wbytes = 2  # bf16
    weight_bytes = (K * H1 + H1 * H2 + H2 * N) * wbytes + (H1 + H2 + N) * 4
    io_bytes = 2 * (TB * K * 4 + TB * N * 4)                       # double-buffered x/out tiles
    act_bytes = TB * (H1 + H2) * (4 + wbytes) + TB * K * wbytes    # f32 acts + bf16 copies
    vmem_need = 2 * weight_bytes + io_bytes + act_bytes
    vmem_limit = min(2 * vmem_need + (4 << 20), 48 << 20)

    cost = pl.CostEstimate(
        flops=2 * B * (K * H1 + H1 * H2 + H2 * N),
        transcendentals=0,
        bytes_accessed=B * K * 4 + weight_bytes + B * N * 4,
    )

    return pl.pallas_call(
        mlp_kernel,
        out_shape=jax.ShapeDtypeStruct((B, N), jnp.float32),
        grid=grid,
        in_specs=in_specs,
        out_specs=out_specs,
        compiler_params=pltpu.CompilerParams(
            dimension_semantics=("parallel",),
            vmem_limit_bytes=int(vmem_limit),
        ),
        cost_estimate=cost,
    )(x, w1, b1, w2, b2, w3, b3)


def init_params(key, input_size, num_classes):
    """Deterministic init mirroring nn.Linear default (uniform(-1/sqrt(fan_in), +1/sqrt(fan_in)))."""
    dims = [(input_size, 512), (512, 128), (128, num_classes)]
    params = []
    for fan_in, fan_out in dims:
        key, kw, kb = jax.random.split(key, 3)
        bound = 1.0 / jnp.sqrt(float(fan_in))
        w = jax.random.uniform(kw, (fan_in, fan_out), jnp.float32, -bound, bound)
        b = jax.random.uniform(kb, (1, fan_out), jnp.float32, -bound, bound)
        params.extend([w, b])
    return tuple(params)


def reference_forward(x, packed_params):
    """Pure-JAX reference mirroring the kernel's bf16-operand / f32-accumulate math."""
    w1, b1, w2, b2, w3, b3 = packed_params
    cd = jnp.bfloat16
    h1 = jnp.dot(x.astype(cd), w1, preferred_element_type=jnp.float32)
    h1 = jnp.maximum(h1 + b1, 0.0)
    h2 = jnp.dot(h1.astype(cd), w2, preferred_element_type=jnp.float32)
    h2 = jnp.maximum(h2 + b2, 0.0)
    out = jnp.dot(h2.astype(cd), w3, preferred_element_type=jnp.float32)
    return out + b3


if __name__ == "__main__":
    key = jax.random.PRNGKey(0)
    batch_size = 2
    input_size = 32
    num_classes = 8

    key, kx, kp = jax.random.split(key, 3)
    x = jax.random.normal(kx, (batch_size, input_size), jnp.float32)
    params = init_params(kp, input_size, num_classes)
    packed = prepare_params(params)   # one-time weight packing (bf16 cast), outside the forward

    logits = clause_classifier_forward(x, packed)
    jax.block_until_ready(logits)

    # Correctness check against a pure-JAX reference (same bf16/f32 mixed precision).
    ref = reference_forward(x, packed)
    assert logits.shape == (batch_size, num_classes)
    assert jnp.allclose(logits, ref, atol=1e-2, rtol=1e-2), "mismatch vs reference"

    print("KERNEL_OK")
</pallas_src>

<mosaic_0001>
module attributes {stable_mosaic.version = 11 : i64} {
  func.func @mlp_kernel(%arg0: i32, %arg1: memref<2x32xf32, #tpu.memory_space<vmem>>, %arg2: memref<32x512xbf16, #tpu.memory_space<vmem>>, %arg3: memref<1x512xf32, #tpu.memory_space<vmem>>, %arg4: memref<512x128xbf16, #tpu.memory_space<vmem>>, %arg5: memref<1x128xf32, #tpu.memory_space<vmem>>, %arg6: memref<128x8xbf16, #tpu.memory_space<vmem>>, %arg7: memref<1x8xf32, #tpu.memory_space<vmem>>, %arg8: memref<2x8xf32, #tpu.memory_space<vmem>>) attributes {dimension_semantics = [#tpu.dimension_semantics<parallel>], iteration_bounds = array<i64: 1>, scalar_prefetch = 0 : i64, scratch_operands = 0 : i64, tpu.core_type = #tpu.core_type<tc>, window_params = [{transform_indices = @transform_0, window_bounds = array<i64: 2, 32>}, {pipeline_mode = #tpu.pipeline_mode<synchronous>, transform_indices = @transform_1, window_bounds = array<i64: 32, 512>}, {pipeline_mode = #tpu.pipeline_mode<synchronous>, transform_indices = @transform_2, window_bounds = array<i64: 1, 512>}, {pipeline_mode = #tpu.pipeline_mode<synchronous>, transform_indices = @transform_3, window_bounds = array<i64: 512, 128>}, {pipeline_mode = #tpu.pipeline_mode<synchronous>, transform_indices = @transform_4, window_bounds = array<i64: 1, 128>}, {pipeline_mode = #tpu.pipeline_mode<synchronous>, transform_indices = @transform_5, window_bounds = array<i64: 128, 8>}, {pipeline_mode = #tpu.pipeline_mode<synchronous>, transform_indices = @transform_6, window_bounds = array<i64: 1, 8>}, {transform_indices = @transform_7, window_bounds = array<i64: 2, 8>}]} {
    %c0 = arith.constant 0 : index
    %c0_0 = arith.constant 0 : index
    %0 = vector.load %arg1[%c0, %c0_0] : memref<2x32xf32, #tpu.memory_space<vmem>>, vector<2x32xf32>
    %1 = arith.truncf %0 : vector<2x32xf32> to vector<2x32xbf16>
    %c0_1 = arith.constant 0 : index
    %c0_2 = arith.constant 0 : index
    %2 = vector.load %arg2[%c0_1, %c0_2] : memref<32x512xbf16, #tpu.memory_space<vmem>>, vector<32x512xbf16>
    %cst = arith.constant dense<0.000000e+00> : vector<2x512xf32>
    %3 = tpu.matmul %1, %2, %cst {dimension_numbers = #tpu.dot_dimension_numbers<[1], [0], [0], [1], [0, 0, 1, 1], [], []>} : vector<2x32xbf16>, vector<32x512xbf16>, vector<2x512xf32> -> vector<2x512xf32>
    %c0_3 = arith.constant 0 : index
    %c0_4 = arith.constant 0 : index
    %4 = vector.load %arg3[%c0_3, %c0_4] : memref<1x512xf32, #tpu.memory_space<vmem>>, vector<1x512xf32>
    %5 = vector.broadcast %4 : vector<1x512xf32> to vector<2x512xf32>
    %6 = arith.addf %3, %5 : vector<2x512xf32>
    %cst_5 = arith.constant 0.000000e+00 : f32
    %7 = vector.broadcast %cst_5 : f32 to vector<2x512xf32>
    %8 = arith.maximumf %6, %7 : vector<2x512xf32>
    %9 = arith.truncf %8 : vector<2x512xf32> to vector<2x512xbf16>
    %c0_6 = arith.constant 0 : index
    %c0_7 = arith.constant 0 : index
    %10 = vector.load %arg4[%c0_6, %c0_7] : memref<512x128xbf16, #tpu.memory_space<vmem>>, vector<512x128xbf16>
    %cst_8 = arith.constant dense<0.000000e+00> : vector<2x128xf32>
    %11 = tpu.matmul %9, %10, %cst_8 {dimension_numbers = #tpu.dot_dimension_numbers<[1], [0], [0], [1], [0, 0, 1, 1], [], []>} : vector<2x512xbf16>, vector<512x128xbf16>, vector<2x128xf32> -> vector<2x128xf32>
    %c0_9 = arith.constant 0 : index
    %c0_10 = arith.constant 0 : index
    %12 = vector.load %arg5[%c0_9, %c0_10] : memref<1x128xf32, #tpu.memory_space<vmem>>, vector<1x128xf32>
    %13 = vector.broadcast %12 : vector<1x128xf32> to vector<2x128xf32>
    %14 = arith.addf %11, %13 : vector<2x128xf32>
    %cst_11 = arith.constant 0.000000e+00 : f32
    %15 = vector.broadcast %cst_11 : f32 to vector<2x128xf32>
    %16 = arith.maximumf %14, %15 : vector<2x128xf32>
    %17 = arith.truncf %16 : vector<2x128xf32> to vector<2x128xbf16>
    %c0_12 = arith.constant 0 : index
    %c0_13 = arith.constant 0 : index
    %18 = vector.load %arg6[%c0_12, %c0_13] : memref<128x8xbf16, #tpu.memory_space<vmem>>, vector<128x8xbf16>
    %cst_14 = arith.constant dense<0.000000e+00> : vector<2x8xf32>
    %19 = tpu.matmul %17, %18, %cst_14 {dimension_numbers = #tpu.dot_dimension_numbers<[1], [0], [0], [1], [0, 0, 1, 1], [], []>} : vector<2x128xbf16>, vector<128x8xbf16>, vector<2x8xf32> -> vector<2x8xf32>
    %c0_15 = arith.constant 0 : index
    %c0_16 = arith.constant 0 : index
    %20 = vector.load %arg7[%c0_15, %c0_16] : memref<1x8xf32, #tpu.memory_space<vmem>>, vector<1x8xf32>
    %21 = vector.broadcast %20 : vector<1x8xf32> to vector<2x8xf32>
    %22 = arith.addf %19, %21 : vector<2x8xf32>
    %c0_17 = arith.constant 0 : index
    %c0_18 = arith.constant 0 : index
    %23 = vector.load %arg8[%c0_17, %c0_18] : memref<2x8xf32, #tpu.memory_space<vmem>>, vector<2x8xf32>
    tpu.vector_store %arg8[%c0_17, %c0_18], %22 {strides = array<i32>} : memref<2x8xf32, #tpu.memory_space<vmem>>, vector<2x8xf32>,
    return
  }
  func.func @transform_0(%arg0: i32) -> (i32, i32) {
    %c0_i32 = arith.constant 0 : i32
    %c0_i32_0 = arith.constant 0 : i32
    return %arg0, %c0_i32 : i32, i32
  }
  func.func @transform_1(%arg0: i32) -> (i32, i32) {
    %c0_i32 = arith.constant 0 : i32
    %c0_i32_0 = arith.constant 0 : i32
    %c0_i32_1 = arith.constant 0 : i32
    return %c0_i32, %c0_i32_0 : i32, i32
  }
  func.func @transform_2(%arg0: i32) -> (i32, i32) {
    %c0_i32 = arith.constant 0 : i32
    %c0_i32_0 = arith.constant 0 : i32
    %c0_i32_1 = arith.constant 0 : i32
    return %c0_i32, %c0_i32_0 : i32, i32
  }
  func.func @transform_3(%arg0: i32) -> (i32, i32) {
    %c0_i32 = arith.constant 0 : i32
    %c0_i32_0 = arith.constant 0 : i32
    %c0_i32_1 = arith.constant 0 : i32
    return %c0_i32, %c0_i32_0 : i32, i32
  }
  func.func @transform_4(%arg0: i32) -> (i32, i32) {
    %c0_i32 = arith.constant 0 : i32
    %c0_i32_0 = arith.constant 0 : i32
    %c0_i32_1 = arith.constant 0 : i32
    return %c0_i32, %c0_i32_0 : i32, i32
  }
  func.func @transform_5(%arg0: i32) -> (i32, i32) {
    %c0_i32 = arith.constant 0 : i32
    %c0_i32_0 = arith.constant 0 : i32
    %c0_i32_1 = arith.constant 0 : i32
    return %c0_i32, %c0_i32_0 : i32, i32
  }
  func.func @transform_6(%arg0: i32) -> (i32, i32) {
    %c0_i32 = arith.constant 0 : i32
    %c0_i32_0 = arith.constant 0 : i32
    %c0_i32_1 = arith.constant 0 : i32
    return %c0_i32, %c0_i32_0 : i32, i32
  }
  func.func @transform_7(%arg0: i32) -> (i32, i32) {
    %c0_i32 = arith.constant 0 : i32
    %c0_i32_0 = arith.constant 0 : i32
    return %arg0, %c0_i32 : i32, i32
  }
}

</mosaic_0001>

<bundles_post_ra>
// kernel: clause_classifier_forward.1
= control target key start
LH: loop header
LB: loop body
LE: loop exit
PB: predicated region body
PF: predicated region fallthrough
CT: control target
= control target key end

     0   :  { %12 = vsyncpa [#allocation3], 0  ;;  %s1046_s0 = inlined_call_operand.vmem [shape: f32[2,32], index: 0, kind: input, shape index: {}]   ;;  %s1047_s1 = inlined_call_operand.vmem [shape: bf16[32,512], index: 1, kind: input, shape index: {}]   ;;  %s1048_s2 = inlined_call_operand.vmem [shape: f32[1,512], index: 2, kind: input, shape index: {}]   ;;  %s1049_s3 = inlined_call_operand.hbm [shape: bf16[512,128], index: 3, kind: input, shape index: {}]   ;;  %s1050_s4 = inlined_call_operand.vmem [shape: f32[1,128], index: 4, kind: input, shape index: {}]   ;;  %s1051_s5 = inlined_call_operand.vmem [shape: bf16[128,8], index: 5, kind: input, shape index: {}]   ;;  %s1052_s6 = inlined_call_operand.vmem [shape: f32[1,8], index: 6, kind: input, shape index: {}]   ;;  %s1053_s7 = inlined_call_operand.hbm [shape: f32[2,8], index: 7, kind: output, shape index: {}]  }
   0x1   :  { %13 = vsyncpa [#allocation4], 0  ;;  %s913_s24 = smov [#allocation2]   ;;  %s865_s28 = scalar_lea.hbm %s1049_s3, 4096 }
   0x2   :  { %s25_s25 = sshll.u32 %s913_s24, 4  ;;  %p866_p0 = scmp.ne.s32.totalorder %s1049_s3, %s865_s28  ;;  %s26_s25 = int_to_ptr.vmem [resolvable:$true] %s25_s25 }
   0x3   :  { %p869_p1 = scmp.lt.u32.totalorder %s865_s28, %s1049_s3 }
   0x5   :  { %p871_p2 = pnand %p869_p1, %p866_p0 }
   0x7   :  { %874 = shalt.err (!%p871_p2)
}
   0x8   :  { %s875_s10 = scalar_lea.vmem %s26_s25, 4096  ;;  %p880_p4 = scmp.lt.s32.totalorder %s26_s25, %s26_s25 }
   0x9   :  { %p876_p3 = scmp.ne.s32.totalorder %s26_s25, %s875_s10  ;;  %p881_p5 = scmp.lt.s32.totalorder %s875_s10, %s875_s10 }
   0xb   :  { %p882_p6 = por %p881_p5, %p880_p4 }
   0xd   :  { %p883_p7 = pnand %p882_p6, %p876_p3 }
   0xf   :  { %886 = shalt.err (!%p883_p7)
}
  0x10   :  { %s914_s11 = smov 64   ;;  %s915_s12 = smov 4  }
  0x11   :  { %31 = dma.hbm_to_vmem [thread:$0]  %s1049_s3, 4096, %s26_s25, [#allocation3], %s914_s11, %s914_s11, %s915_s12  }
  0x12   :  { %909 = dma.done.wait [#allocation3], 4096  }
  0x13   :  { %910 = vsyncadd [#allocation3], 4294963200  ;;  %v916_v0 = vmov 0   ;;  %v813_v1 = vld [vmem:[%s1047_s1 + $0x4] ss:$16 sps:$4 sm:$0xff]   ;;  %vm114_vm0 = vcmask 261120   ;;  %v54_v44 = vlaneseq }
  0x14   :  { %150 = vmatprep.mubr.bf16.mxu1 %v916_v0  ;;  %v815_v2 = vld [vmem:[%s1047_s1] ss:$16 sps:$4 sm:$0xff]   ;;  %118 = vmatprep.subr.bf16.mxu1 %v813_v1  ;;  %v816_v3 = vld [vmem:[%s1047_s1 + $0x24] ss:$16 sps:$4 sm:$0xff]   ;;  %v821_v6 = vld [vmem:[%s1047_s1 + $0xc] ss:$16 sps:$4 sm:$0xff]  }
  0x15   :  { %v818_v4 = vld [vmem:[%s1047_s1 + $0x20] ss:$16 sps:$4 sm:$0xff]   ;;  %119 = vmatpush1.bf16.msra.mxu1 %v815_v2  ;;  %v819_v7 = vld [vmem:[%s1047_s1 + $0x8] ss:$16 sps:$4 sm:$0xff]   ;;  %v824_v9 = vld [vmem:[%s1047_s1 + $0x2c] ss:$16 sps:$4 sm:$0xff]  }
  0x16   :  { %v42_v5 = vld [vmem:[%s1046_s0] sm:$0x3]  ;;  %120 = vmatprep.subr.bf16.mxu1 %v816_v3  ;;  %v827_v12 = vld [vmem:[#allocation2 + $0x48] sm:$0xff]   ;;  %v829_v14 = vld [vmem:[#allocation2 + $0x50] sm:$0xff]   ;;  %v917_v43 = vmov 0.0   ;;  %v55_v45 = vshrl.u32 %v54_v44, 7 }
  0x17   :  { %v43_v8 = vpack.c.bf16 %v42_v5, %v42_v5  ;;  %v825_v10 = vld [vmem:[#allocation2 + $0x40] sm:$0xff]   ;;  %v828_v13 = vld [vmem:[#allocation2 + $0x8] sm:$0xff]   ;;  %v831_v17 = vld [vmem:[#allocation2 + $0x10] sm:$0xff]   ;;  %vm918_vm1 = vmmov 0   ;;  %s919_s26 = smov [#allocation5]   ;;  %vm664_vm2 = vcmask 58368  }
  0x18   :  { %v826_v11 = vld [vmem:[#allocation2] sm:$0xff]   ;;  %733 = vmatprep.subr.bf16.mxu0 %v825_v10  ;;  %v822_v15 = vld [vmem:[%s1047_s1 + $0x28] ss:$16 sps:$4 sm:$0xff]   ;;  %v838_v24 = vld [vmem:[#allocation2 + $0xd0] sm:$0xff]   ;;  %v56_v46 = vsub.s32 0, %v55_v45  ;;  %v60_v48 = vsub.s32 1, %v55_v45 }
  0x19   :  { %121 = vmatpush1.bf16.msra.mxu1 %v818_v4  ;;  %734 = vmatpush3.bf16.msra.mxu0 %v826_v11  ;;  %v830_v16 = vld [vmem:[#allocation2 + $0xc0] sm:$0xff]   ;;  %v833_v18 = vld [vmem:[#allocation2 + $0x58] sm:$0xff]   ;;  %v834_v20 = vld [vmem:[#allocation2 + $0xc8] sm:$0xff]   ;;  %v64_v54 = vsub.s32 2, %v55_v45  ;;  %v68_v57 = vsub.s32 3, %v55_v45  ;;  %s672_s27 = sshll.u32 %s919_s26, 4  ;;  %s673_s27 = int_to_ptr.vmem [resolvable:$true] %s672_s27 }
  0x1a   :  { %159 = vmatprep.subr.bf16.mxu1 %v821_v6  ;;  %735 = vmatprep.subr.bf16.mxu0 %v827_v12  ;;  %v832_v19 = vld [vmem:[#allocation2 + $0x80] sm:$0xff]   ;;  %v835_v21 = vld [vmem:[#allocation2 + $0x18] sm:$0xff]   ;;  %v836_v23 = vld [vmem:[#allocation2 + $0x88] sm:$0xff]   ;;  %p892_p9 = scmp.lt.s32.totalorder %s673_s27, %s673_s27 }
  0x1b   :  { %v837_v22 = vld [vmem:[#allocation2 + $0x60] sm:$0xff]   ;;  %v841_v26 = vld [vmem:[#allocation2 + $0x68] sm:$0xff]   ;;  %v840_v27 = vld [vmem:[#allocation2 + $0x90] sm:$0xff]  }
  0x1c   :  { %689 = vmatmul.mubr.msk.bf16.vlgmr.msra.gmra.mrb[0].mxu1 %vm114_vm0, %v43_v8  ;;  %v839_v25 = vld [vmem:[#allocation2 + $0x20] sm:$0xff]   ;;  %v842_v28 = vld [vmem:[#allocation2 + $0xd8] sm:$0xff]   ;;  %v843_v29 = vld [vmem:[#allocation2 + $0x28] sm:$0xff]  }
  0x1d   :  { %160 = vmatpush1.bf16.msra.mxu1 %v819_v7  ;;  %191 = vmatprep.mubr.bf16.mxu1 %v916_v0  ;;  %v844_v30 = vld [vmem:[#allocation2 + $0x98] sm:$0xff]   ;;  %v845_v31 = vld [vmem:[#allocation2 + $0x70] sm:$0xff]   ;;  %v846_v32 = vld [vmem:[#allocation2 + $0xe0] sm:$0xff]  }
  0x1e   :  { %161 = vmatprep.subr.bf16.mxu1 %v824_v9  ;;  %736 = vmatpush3.bf16.msra.mxu0 %v828_v13  ;;  %v847_v33 = vld [vmem:[#allocation2 + $0x30] sm:$0xff]   ;;  %v848_v34 = vld [vmem:[#allocation2 + $0xa0] sm:$0xff]   ;;  %v849_v35 = vld [vmem:[#allocation2 + $0x78] sm:$0xff]  }
  0x1f   :  { %737 = vmatprep.subr.bf16.mxu0 %v829_v14  ;;  %v850_v36 = vld [vmem:[#allocation2 + $0xe8] sm:$0xff]   ;;  %v851_v37 = vld [vmem:[#allocation2 + $0x38] sm:$0xff]   ;;  %v853_v39 = vld [vmem:[#allocation2 + $0xf0] sm:$0xff]  }
  0x20   :  { %v852_v38 = vld [vmem:[#allocation2 + $0xa8] sm:$0xff]   ;;  %v854_v40 = vld [vmem:[#allocation2 + $0xb0] sm:$0xff]   ;;  %v855_v41 = vld [vmem:[#allocation2 + $0xf8] sm:$0xff]  }
  0x21   :  { %162 = vmatpush1.bf16.msra.mxu1 %v822_v15  ;;  %v856_v42 = vld [vmem:[#allocation2 + $0xb8] sm:$0xff]   ;;  %v52_v47 = vld [vmem:[%s1048_s2] sm:$0xf]  ;;  %v858_v7 = vld [vmem:[%s1051_s5 + $0x8] sm:$0xff]  }
  0x22   :  { %755 = vmatprep.subr.bf16.mxu1 %v830_v16  ;;  %738 = vmatpush3.bf16.msra.mxu0 %v831_v17  ;;  %v57_v49 = vrot.slane %v52_v47, %v56_v46  ;;  %v61_v50 = vrot.slane %v52_v47, %v60_v48  ;;  %v65_v61 = vrot.slane %v52_v47, %v64_v54  ;;  %v857_v0 = vld [vmem:[%s1051_s5] sm:$0xff]   ;;  %v859_v12 = vld [vmem:[%s1051_s5 + $0x10] sm:$0xff]   ;;  %v860_v14 = vld [vmem:[%s1051_s5 + $0x18] sm:$0xff]  }
  0x23   :  { %739 = vmatprep.subr.bf16.mxu0 %v833_v18  ;;  %v69_v63 = vrot.slane %v52_v47, %v68_v57  ;;  %v861_v15 = vld [vmem:[%s1051_s5 + $0x20] sm:$0xff]   ;;  %v862_v16 = vld [vmem:[%s1051_s5 + $0x28] sm:$0xff]   ;;  %v863_v17 = vld [vmem:[%s1051_s5 + $0x30] sm:$0xff]  }
  0x24   :  { %690 = vmatmul.mubr.msk.bf16.vlgmr.msra.gmra.mrb[4].mxu1 %vm114_vm0, %v43_v8  ;;  %v864_v18 = vld [vmem:[%s1051_s5 + $0x38] sm:$0xff]  }
  0x25   :  { %756 = vmatpush3.bf16.msra.mxu1 %v832_v19 }
  0x26   :  { %757 = vmatprep.subr.bf16.mxu1 %v834_v20  ;;  %740 = vmatpush3.bf16.msra.mxu0 %v835_v21 }
  0x27   :  { %741 = vmatprep.subr.bf16.mxu0 %v837_v22 }
  0x29   :  { %758 = vmatpush3.bf16.msra.mxu1 %v836_v23 }
  0x2a   :  { %759 = vmatprep.subr.bf16.mxu1 %v838_v24  ;;  %742 = vmatpush3.bf16.msra.mxu0 %v839_v25  ;;  %v691_v24 = vld [vmem:[%s1050_s4] ss:$0 sm:$0xff]  ;;  %s887_s4 = scalar_lea.vmem %s673_s27, 32 }
  0x2b   :  { %743 = vmatprep.subr.bf16.mxu0 %v841_v26  ;;  %p888_p8 = scmp.ne.s32.totalorder %s673_s27, %s887_s4  ;;  %p893_p10 = scmp.lt.s32.totalorder %s887_s4, %s887_s4 }
  0x2d   :  { %760 = vmatpush3.bf16.msra.mxu1 %v840_v27  ;;  %p894_p11 = por %p893_p10, %p892_p9 }
  0x2e   :  { %761 = vmatprep.subr.bf16.mxu1 %v842_v28  ;;  %744 = vmatpush3.bf16.msra.mxu0 %v843_v29 }
  0x2f   :  { %745 = vmatprep.subr.bf16.mxu0 %v845_v31  ;;  %p895_p12 = pnand %p894_p11, %p888_p8 }
  0x31   :  { %762 = vmatpush3.bf16.msra.mxu1 %v844_v30 }
  0x32   :  { %763 = vmatprep.subr.bf16.mxu1 %v846_v32  ;;  %746 = vmatpush3.bf16.msra.mxu0 %v847_v33 }
  0x33   :  { %747 = vmatprep.subr.bf16.mxu0 %v849_v35 }
  0x35   :  { %764 = vmatpush3.bf16.msra.mxu1 %v848_v34  ;;  %v724_v34 = vld [vmem:[%s1052_s6] ss:$0 sm:$0xff] }
  0x36   :  { %765 = vmatprep.subr.bf16.mxu1 %v850_v36  ;;  %748 = vmatpush3.bf16.msra.mxu0 %v851_v37 }
  0x37   :  { %786 = vmatprep.subr.bf16.mxu0 %v917_v43 }
  0x39   :  { %766 = vmatpush3.bf16.msra.mxu1 %v852_v38 }
  0x3a   :  { %767 = vmatprep.subr.bf16.mxu1 %v853_v39 }
  0x3d   :  { %768 = vmatpush3.bf16.msra.mxu1 %v854_v40 }
  0x3e   :  { %769 = vmatprep.subr.bf16.mxu1 %v855_v41 }
  0x41   :  { %770 = vmatpush3.bf16.msra.mxu1 %v856_v42 }
  0xef   :  { %v152_v51 = vpop.f32.mrb[0].mxu1 }
  0xf0   :  { %v153_v52 = vadd.f32 %v152_v51, %v57_v49  ;;  %v154_v53 = vpop.f32.mrb[1].mxu1 }
  0xf1   :  { %v155_v55 = vadd.f32 %v154_v53, %v61_v50  ;;  %v156_v56 = vpop.f32.mrb[2].mxu1 }
  0xf2   :  { %v200_v58 = vmax.f32 %v153_v52, 0.0  ;;  %v157_v59 = vpop.f32.mrb[3].mxu1 }
  0xf3   :  { %v201_v60 = vmax.f32 %v155_v55, 0.0 }
  0xf4   :  { %v204_v1 = vpack.c.bf16 %v200_v58, %v200_v58 }
  0xf5   :  { %v205_v62 = vpack.c.bf16 %v201_v60, %v201_v60 }
  0xf7   :  { %v193_v2 = vpop.f32.mrb[4].mxu1  ;;  %503 = vmatprep.mubr.bf16.mxu0 %v205_v62 }
  0xf8   :  { %v194_v3 = vadd.f32 %v193_v2, %v65_v61  ;;  %v195_v4 = vpop.f32.mrb[5].mxu1  ;;  %504 = vmatmul.mubr.bf16.vlgmr.msra.gmra.mrb[0].mxu0 %v204_v1 }
  0xf9   :  { %v196_v5 = vadd.f32 %v195_v4, %v69_v63  ;;  %v197_v6 = vpop.f32.mrb[6].mxu1  ;;  %787 = vmatpush3.bf16.msra.mxu0 %v857_v0  ;;  %802 = vmatprep.mubr.msk.bf16.mxu0 %vm918_vm1, %v917_v43 }
  0xfa   :  { %v202_v8 = vmax.f32 %v194_v3, 0.0  ;;  %v198_v9 = vpop.f32.mrb[7].mxu1  ;;  %788 = vmatprep.subr.bf16.mxu0 %v917_v43 }
  0xfb   :  { %v203_v10 = vmax.f32 %v196_v5, 0.0 }
  0xfc   :  { %v206_v13 = vpack.c.bf16 %v202_v8, %v202_v8 }
  0xfd   :  { %v207_v11 = vpack.c.bf16 %v203_v10, %v203_v10  ;;  %789 = vmatpush3.bf16.msra.mxu0 %v858_v7 }
  0xfe   :  { %790 = vmatprep.subr.bf16.mxu0 %v917_v43 }
  0xff   :  { %543 = vmatprep.mubr.bf16.mxu1 %v207_v11 }
 0x100   :  { %544 = vmatmul.mubr.bf16.vlgmr.msra.gmra.mrb[8].mxu1 %v206_v13 }
 0x101   :  { %791 = vmatpush3.bf16.msra.mxu0 %v859_v12 }
 0x102   :  { %792 = vmatprep.subr.bf16.mxu0 %v917_v43 }
 0x105   :  { %793 = vmatpush3.bf16.msra.mxu0 %v860_v14 }
 0x106   :  { %794 = vmatprep.subr.bf16.mxu0 %v917_v43 }
 0x109   :  { %795 = vmatpush3.bf16.msra.mxu0 %v861_v15 }
 0x10a   :  { %796 = vmatprep.subr.bf16.mxu0 %v917_v43 }
 0x10d   :  { %797 = vmatpush3.bf16.msra.mxu0 %v862_v16 }
 0x10e   :  { %798 = vmatprep.subr.bf16.mxu0 %v917_v43 }
 0x111   :  { %799 = vmatpush3.bf16.msra.mxu0 %v863_v17 }
 0x112   :  { %800 = vmatprep.subr.bf16.mxu0 %v917_v43 }
 0x115   :  { %801 = vmatpush3.bf16.msra.mxu0 %v864_v18 }
 0x1cb   :  { %v749_v19 = vpop.f32.mrb[0].mxu0 }
 0x1cc   :  { %v750_v20 = vpop.f32.mrb[1].mxu0 }
 0x1cd   :  { %v751_v21 = vadd.f32 %v750_v20, %v749_v19  ;;  %v752_v22 = vpop.f32.mrb[2].mxu0 }
 0x1ce   :  { %v753_v23 = vpop.f32.mrb[3].mxu0 }
 0x1cf   :  { %v506_v27 = vadd.f32 %v751_v21, %v691_v24 }
 0x1d3   :  { %v771_v25 = vpop.f32.mrb[8].mxu1 }
 0x1d4   :  { %v772_v26 = vpop.f32.mrb[9].mxu1 }
 0x1d5   :  { %v773_v28 = vadd.f32 %v772_v26, %v771_v25  ;;  %v774_v29 = vpop.f32.mrb[10].mxu1 }
 0x1d6   :  { %v775_v30 = vpop.f32.mrb[11].mxu1 }
 0x1d7   :  { %v546_v31 = vadd.f32 %v773_v28, %v506_v27 }
 0x1d9   :  { %v551_v32 = vmax.f32 %v546_v31, 0.0 }
 0x1db   :  { %v552_v33 = vpack.c.bf16 %v551_v32, %v551_v32 }
 0x1dd   :  { %803 = vmatmul.mubr.bf16.vlgmr.msra.gmra.mrb[4].mxu0 %v552_v33 }
 0x2b0   :  { %v658_v35 = vpop.f32.mrb[4].mxu0 }
 0x2b1   :  { %v659_v36 = vadd.f32 %v724_v34, %v658_v35  ;;  %v804_v37 = vpop.f32.mrb[5].mxu0 }
 0x2b2   :  { %v661_v38 = vpop.f32.mrb[6].mxu0 }
 0x2b3   :  { %v805_v39 = vpop.f32.mrb[7].mxu0  ;;  %665 = vst.msk [vmem:[#allocation5] sm:$0x3] %vm664_vm2, %v659_v36 }
 0x2b4   :  { %898 = shalt.err (!%p895_p12)
}
 0x2b5   :  { %s899_s6 = scalar_lea.hbm %s1053_s7, 32 }
 0x2b6   :  { %p900_p13 = scmp.ne.s32.totalorder %s1053_s7, %s899_s6  ;;  %p903_p0 = scmp.lt.u32.totalorder %s899_s6, %s1053_s7 }
 0x2b8   :  { %p905_p1 = pnand %p903_p0, %p900_p13 }
 0x2ba   :  { %908 = shalt.err (!%p905_p1)
}
 0x2bb   :  { %675 = dma.vmem_to_hbm [thread:$0]  %s673_s27, 32, %s1053_s7, [#allocation4]  }
 0x2bc   :  { %911 = dma.done.wait [#allocation4], 32  }
 0x2bd   :  { %912 = vsyncadd [#allocation4], 4294967264 }
 0x2be   :  { %679 = vsyncpa [#allocation3], 1 }
 0x2bf   :  { %680 = vsyncpa [#allocation4], 1 }

</bundles_post_ra>
